<compile_context>
chip_gen: v7x
topology: tpu7x:2x2x1
jax: 0.10.0
libtpu: 0.0.40
codegen_flags: <defaults>
</compile_context>

<pallas_src>
import functools

import jax
import jax.numpy as jnp
from jax.experimental import pallas as pl
from jax.experimental.pallas import tpu as pltpu


def _line_embedding_kernel(x_ref, emb_ref, o_ref, *, line_sep_id, max_lines,
                           scale):
    # x_ref:   (1, tb, T)        int32 token ids (one batch tile)
    # emb_ref: (max_lines, dim)  f32 embedding table (constant across grid)
    # o_ref:   (1, tb*T, dim)    f32 output (lane-dense 2D slab per tile)
    x = x_ref[0]                                    # (tb, T) int32
    tb, t = x.shape

    is_sep = (x == line_sep_id).astype(jnp.int32)   # (tb, T) exact 0/1

    # Inclusive prefix sum along the sequence (lane) axis via log2(T)
    # shift-and-add steps.  Uses only slice + concat + add, so it lowers on
    # every TPU generation and costs O(T log T) VPU work instead of O(T^2)
    # MXU FLOPs + a T*T*4-byte tri buffer.
    n = is_sep
    d = 1
    while d < t:
        shifted = jnp.concatenate(
            [jnp.zeros((tb, d), jnp.int32), n[:, :t - d]], axis=1)
        n = n + shifted
        d *= 2
    n = jnp.minimum(n, max_lines - 1)               # clamp(max=max_lines-1)

    # Gather-as-matmul: exact one-hot over the line index, contracted against
    # the (pre-scaled) table on the MXU.  One-hot built as (tb, T, L) then
    # collapsed along the leading dims only to a lane-dense (tb*T, L) operand.
    iota = jax.lax.broadcasted_iota(jnp.int32, (tb, t, max_lines), 2)
    one_hot = (n[..., None] == iota).astype(jnp.float32)      # (tb, T, L)
    one_hot2d = one_hot.reshape(tb * t, max_lines)            # (tb*T, L)

    # Scale the small (L, dim) table instead of the (tb*T, dim) result.
    table = emb_ref[...] * jnp.float32(scale)                 # (L, dim)

    out2d = jnp.dot(one_hot2d, table,
                    preferred_element_type=jnp.float32)       # (tb*T, dim)
    o_ref[0] = out2d.astype(o_ref.dtype)                      # lane-dense store


def _pick_batch_tile(B, T, dim, max_lines, budget_bytes=8 << 20):
    """Largest divisor of B whose (double-buffered) block fits a conservative
    VMEM budget; prefer >=2 grid steps so pipelining / megacore can kick in.
    The 8 MiB budget leaves ample headroom on v7x (64 MiB VMEM)."""
    def block_bytes(tb):
        x_b = tb * T * 4
        out_b = tb * T * dim * 4
        onehot_b = tb * T * max_lines * 4
        return 2 * (x_b + out_b) + onehot_b
    divisors = [d for d in range(1, B + 1) if B % d == 0]
    fits = [d for d in divisors if block_bytes(d) <= budget_bytes] or [1]
    multi = [d for d in fits if B // d >= 2]
    return max(multi) if multi else max(fits)


def line_embedding(x, emb_table, *, line_sep_id=5, max_lines=32):
    """x: (B, T) integer token ids; emb_table: (max_lines, dim) f32.

    Returns (B, T, dim) f32 — identical to LineEmbedding.forward.
    """
    B, T = x.shape
    L, dim = emb_table.shape
    assert L == max_lines
    scale = float(dim) ** (-0.5)

    tb = _pick_batch_tile(B, T, dim, max_lines)
    n_tiles = B // tb

    # Reshape so every block equals the full extent of its last two dims
    # (keeps the (8,128) BlockSpec constraint satisfied for any tb, T, dim).
    x3 = x.astype(jnp.int32).reshape(n_tiles, tb, T)

    kernel = functools.partial(_line_embedding_kernel,
                               line_sep_id=line_sep_id,
                               max_lines=max_lines,
                               scale=scale)

    cost = pl.CostEstimate(
        flops=2 * B * T * max_lines * dim,          # one-hot @ table
        transcendentals=0,
        bytes_accessed=B * T * 4 + B * T * dim * 4 + max_lines * dim * 4,
    )

    out = pl.pallas_call(
        kernel,
        out_shape=jax.ShapeDtypeStruct((n_tiles, tb * T, dim), jnp.float32),
        grid_spec=pltpu.PrefetchScalarGridSpec(
            num_scalar_prefetch=0,
            grid=(n_tiles,),
            in_specs=[
                pl.BlockSpec((1, tb, T), lambda i: (i, 0, 0)),      # x tile
                # Constant block index: the table is DMA'd once and reused.
                pl.BlockSpec((max_lines, dim), lambda i: (0, 0)),   # table
            ],
            out_specs=pl.BlockSpec((1, tb * T, dim), lambda i: (i, 0, 0)),
        ),
        compiler_params=pltpu.CompilerParams(
            dimension_semantics=("parallel",),        # batch tiles independent
            vmem_limit_bytes=32 * 1024 * 1024,
        ),
        cost_estimate=cost,
    )(x3, emb_table.astype(jnp.float32))

    return out.reshape(B, T, dim)


def line_embedding_ref(x, emb_table, *, line_sep_id=5, max_lines=32):
    """Pure-JAX reference mirroring the PyTorch forward."""
    dim = emb_table.shape[1]
    n = jnp.cumsum((x == line_sep_id).astype(jnp.int32), axis=1)
    n = jnp.minimum(n, max_lines - 1)
    return emb_table[n] * (float(dim) ** (-0.5))


if __name__ == "__main__":
    key = jax.random.PRNGKey(0)
    k_x, k_emb = jax.random.split(key)

    B, T, dim, max_lines, line_sep_id = 2, 8, 32, 32, 5

    # Token ids in [0, 10) so some equal the line separator id (5).
    x = jax.random.randint(k_x, (B, T), 0, 10, dtype=jnp.int32)
    # nn.Embedding default init: N(0, 1).
    emb_table = jax.random.normal(k_emb, (max_lines, dim), dtype=jnp.float32)

    out = line_embedding(x, emb_table, line_sep_id=line_sep_id,
                         max_lines=max_lines)
    out = jax.block_until_ready(out)

    ref = line_embedding_ref(x, emb_table, line_sep_id=line_sep_id,
                             max_lines=max_lines)
    assert out.shape == (B, T, dim)
    assert jnp.allclose(out, ref, atol=1e-5, rtol=1e-5)
    print("KERNEL_OK")
</pallas_src>

<mosaic_0001>
module attributes {stable_mosaic.version = 11 : i64} {
  func.func @_line_embedding_kernel(%arg0: i32, %arg1: memref<1x1x8xi32, #tpu.memory_space<vmem>>, %arg2: memref<32x32xf32, #tpu.memory_space<vmem>>, %arg3: memref<1x8x32xf32, #tpu.memory_space<vmem>>) attributes {dimension_semantics = [#tpu.dimension_semantics<parallel>], iteration_bounds = array<i64: 2>, scalar_prefetch = 0 : i64, scratch_operands = 0 : i64, tpu.core_type = #tpu.core_type<tc>, window_params = [{transform_indices = @transform_0, window_bounds = array<i64: 1, 1, 8>}, {pipeline_mode = #tpu.pipeline_mode<synchronous>, transform_indices = @transform_1, window_bounds = array<i64: 32, 32>}, {transform_indices = @transform_2, window_bounds = array<i64: 1, 8, 32>}]} {
    %c0 = arith.constant 0 : index
    %c0_0 = arith.constant 0 : index
    %c0_1 = arith.constant 0 : index
    %0 = vector.load %arg1[%c0, %c0_0, %c0_1] : memref<1x1x8xi32, #tpu.memory_space<vmem>>, vector<1x1x8xi32>
    %1 = vector.shape_cast %0 : vector<1x1x8xi32> to vector<1x8xi32>
    %c5_i32 = arith.constant 5 : i32
    %2 = vector.broadcast %c5_i32 : i32 to vector<1x8xi32>
    %3 = arith.cmpi eq, %1, %2 : vector<1x8xi32>
    %4 = arith.extui %3 : vector<1x8xi1> to vector<1x8xi32>
    %c0_i32 = arith.constant 0 : i32
    %5 = vector.broadcast %c0_i32 : i32 to vector<1x1xi32>
    %6 = vector.extract_strided_slice %4 {offsets = [0, 0], sizes = [1, 7], strides = [1, 1]} : vector<1x8xi32> to vector<1x7xi32>
    %7 = tpu.concatenate %5, %6 in 1 : vector<1x1xi32>, vector<1x7xi32> -> vector<1x8xi32>
    %8 = arith.addi %4, %7 : vector<1x8xi32>
    %c0_i32_2 = arith.constant 0 : i32
    %9 = vector.broadcast %c0_i32_2 : i32 to vector<1x2xi32>
    %10 = vector.extract_strided_slice %8 {offsets = [0, 0], sizes = [1, 6], strides = [1, 1]} : vector<1x8xi32> to vector<1x6xi32>
    %11 = tpu.concatenate %9, %10 in 1 : vector<1x2xi32>, vector<1x6xi32> -> vector<1x8xi32>
    %12 = arith.addi %8, %11 : vector<1x8xi32>
    %c0_i32_3 = arith.constant 0 : i32
    %13 = vector.broadcast %c0_i32_3 : i32 to vector<1x4xi32>
    %14 = vector.extract_strided_slice %12 {offsets = [0, 0], sizes = [1, 4], strides = [1, 1]} : vector<1x8xi32> to vector<1x4xi32>
    %15 = tpu.concatenate %13, %14 in 1 : vector<1x4xi32>, vector<1x4xi32> -> vector<1x8xi32>
    %16 = arith.addi %12, %15 : vector<1x8xi32>
    %c31_i32 = arith.constant 31 : i32
    %17 = vector.broadcast %c31_i32 : i32 to vector<1x8xi32>
    %18 = arith.minsi %16, %17 : vector<1x8xi32>
    %19 = tpu.iota {dimensions = array<i32: 2>} : vector<1x8x32xi32>
    %20 = vector.shape_cast %18 : vector<1x8xi32> to vector<1x8x1xi32>
    %21 = vector.broadcast %20 : vector<1x8x1xi32> to vector<1x8x32xi32>
    %22 = arith.cmpi eq, %21, %19 : vector<1x8x32xi32>
    %23 = arith.extui %22 : vector<1x8x32xi1> to vector<1x8x32xi32>
    %24 = arith.sitofp %23 : vector<1x8x32xi32> to vector<1x8x32xf32>
    %25 = vector.shape_cast %24 : vector<1x8x32xf32> to vector<8x32xf32>
    %c0_4 = arith.constant 0 : index
    %c0_5 = arith.constant 0 : index
    %26 = vector.load %arg2[%c0_4, %c0_5] : memref<32x32xf32, #tpu.memory_space<vmem>>, vector<32x32xf32>
    %cst = arith.constant 0.176776692 : f32
    %27 = vector.broadcast %cst : f32 to vector<32x32xf32>
    %28 = arith.mulf %26, %27 : vector<32x32xf32>
    %cst_6 = arith.constant dense<0.000000e+00> : vector<8x32xf32>
    %29 = tpu.matmul %25, %28, %cst_6 {dimension_numbers = #tpu.dot_dimension_numbers<[1], [0], [0], [1], [0, 0, 1, 1], [], []>} : vector<8x32xf32>, vector<32x32xf32>, vector<8x32xf32> -> vector<8x32xf32>
    %c0_7 = arith.constant 0 : index
    %c0_8 = arith.constant 0 : index
    %c0_9 = arith.constant 0 : index
    %30 = vector.load %arg3[%c0_7, %c0_8, %c0_9] : memref<1x8x32xf32, #tpu.memory_space<vmem>>, vector<1x8x32xf32>
    %31 = vector.shape_cast %30 : vector<1x8x32xf32> to vector<8x32xf32>
    %32 = vector.shape_cast %29 : vector<8x32xf32> to vector<1x8x32xf32>
    tpu.vector_store %arg3[%c0_7, %c0_8, %c0_9], %32 {strides = array<i32>} : memref<1x8x32xf32, #tpu.memory_space<vmem>>, vector<1x8x32xf32>,
    return
  }
  func.func @transform_0(%arg0: i32) -> (i32, i32, i32) {
    %c0_i32 = arith.constant 0 : i32
    %c0_i32_0 = arith.constant 0 : i32
    %c0_i32_1 = arith.constant 0 : i32
    return %arg0, %c0_i32, %c0_i32_0 : i32, i32, i32
  }
  func.func @transform_1(%arg0: i32) -> (i32, i32) {
    %c0_i32 = arith.constant 0 : i32
    %c0_i32_0 = arith.constant 0 : i32
    %c0_i32_1 = arith.constant 0 : i32
    return %c0_i32, %c0_i32_0 : i32, i32
  }
  func.func @transform_2(%arg0: i32) -> (i32, i32, i32) {
    %c0_i32 = arith.constant 0 : i32
    %c0_i32_0 = arith.constant 0 : i32
    %c0_i32_1 = arith.constant 0 : i32
    return %arg0, %c0_i32, %c0_i32_0 : i32, i32, i32
  }
}

</mosaic_0001>

<bundles_post_ra>
// kernel: tpu_custom_call.1
= control target key start
LH: loop header
LB: loop body
LE: loop exit
PB: predicated region body
PF: predicated region fallthrough
CT: control target
= control target key end

     0   :  { %7 = vsyncpa [#allocation3], 0  ;;  %s845_s0 = inlined_call_operand.hbm [shape: s32[2,1,8], index: 0, kind: input, shape index: {}]   ;;  %s846_s1 = inlined_call_operand.hbm [shape: f32[32,32], index: 1, kind: input, shape index: {}]   ;;  %s847_s2 = inlined_call_operand.hbm [shape: f32[2,8,32], index: 2, kind: output, shape index: {}]  }
   0x1   :  { %9 = vsyncpa [#allocation3 + $0x1], 0 }
   0x2   :  { %10 = vsyncpa [#allocation6], 0 }
   0x3   :  { %11 = vsyncpa [#allocation4], 0 }
   0x4   :  { %13 = vsyncpa [#allocation4 + $0x1], 0  ;;  %s648_s9 = smov 0   ;;  %s650_s10 = smov 0  }
   0x5   :  { %s652_s11 = smov 0   ;;  %s654_s12 = smov 0  }
   0x6 LB: > { %s669_s13 = sadd.s32 4294967295, %s619_s12   ;;  %s389_s14 = sadd.s32 4294967294, %s619_s12   ;;  %s619_s12 = sphi %s654_s12, %s867_s12   ;;  %s615_s11 = sphi %s652_s11, %s866_s11   ;;  %s611_s10 = sphi %s650_s10, %s865_s10   ;;  %s607_s9 = sphi %s648_s9, %s864_s9  }
   0x7   : > { %p39_p0 = scmp.ne.s32.totalorder %s611_s10, %s607_s9  ;;  %p848_p1 = scmp.eq.s32.totalorder %s669_s13, 0 }
   0x8   : > { %p90_p3 = scmp.eq.s32.totalorder %s389_s14, 1  ;;  %p390_p5 = scmp.ge.s32.totalorder %s619_s12, 1 }
   0x9   : > { %p678_p4 = por %p848_p1, %p39_p0  ;;  %p97_p7 = scmp.lt.s32.totalorder %s619_s12, 3 }
   0xa   : > { %p683_p6 = por %p90_p3, %p39_p0  ;;  %s621_s18 = smov [#allocation5]  }
   0xb   : > { %s851_s15 = scalar_select %p678_p4, 1, 0 }
   0xc   : > { %s852_s16 = scalar_select %p683_p6, 1, 0 }
   0xd   : > { %p688_p8 = pnand %p390_p5, %p97_p7  ;;  %s109_s19 = sshll.u32 %s621_s18, 4  ;;  %s692_s19 = int_to_ptr.vmem [resolvable:$true] %s109_s19 }
   0xe   : > { %s704_s21 = sadd.s32 1, %s619_s12   ;;  %s26_s22 = sadd.s32 1, %s615_s11 }
   0xf   : > { %s853_s17 = scalar_select %p688_p8, 1, 0 }
  0x10   : > { %p433_p9 = pneg %p688_p8  ;;  %s23_s23 = ssub.s32 %s619_s12, %s704_s21 }
  0x11   : > { %s491_s26 = scalar_lea.hbm %s846_s1, 512 }
  0x12   : > { %p699_p11 = pnand %p433_p9, %p848_p1  ;;  %p492_p12 = scmp.ne.s32.totalorder %s846_s1, %s491_s26 }
  0x13   : > { %p498_p5 = scmp.lt.u32.totalorder %s491_s26, %s846_s1 }
  0x14   : > { %p493_p13 = pneg %p699_p11 }
  0x16   : > { %p494_p0 = pnand %p493_p13, %p492_p12 }
  0x18   : > { %p495_p3 = pneg %p494_p0 }
  0x1a   : > { %p500_p7 = pnand %p498_p5, %p495_p3 }
  0x1c   : > { %503 = shalt.err (!%p500_p7)
}
  0x1d   : > { %s504_s3 = scalar_lea.vmem %s692_s19, 512  ;;  %p512_p2 = scmp.lt.s32.totalorder %s692_s19, %s692_s19 }
  0x1e   : > { %p505_p9 = scmp.ne.s32.totalorder %s692_s19, %s504_s3  ;;  %p513_p6 = scmp.lt.s32.totalorder %s504_s3, %s504_s3 }
  0x20   : > { %p507_p10 = pnand %p505_p9, %p493_p13  ;;  %p514_p4 = por %p513_p6, %p512_p2 }
  0x22   : > { %p508_p1 = pneg %p507_p10 }
  0x24   : > { %p515_p8 = pnand %p514_p4, %p508_p1 }
  0x26   : > { %518 = shalt.err (!%p515_p8)
}
  0x27   : > { %s622_s4 = smov 128   ;;  %s623_s5 = smov 8  }
  0x28   : > { %436 = dma.hbm_to_vmem [thread:$0]  (!%p699_p11), %s846_s1, 512, %s692_s19, [#allocation6], %s622_s4, %s622_s4, %s623_s5  }
  0x29   : > { %p24_p2 = scmp.eq.s32.totalorder %s23_s23, 0  ;;  %p33_p1 = scmp.ne.s32.totalorder %s615_s11, %s611_s10 }
  0x2a   : > { %p34_p4 = scmp.eq.s32.totalorder %s619_s12, 0  ;;  %p446_p6 = scmp.lt.s32.totalorder %s619_s12, 2 }
  0x2b   : > { %s735_s8 = scalar_select %p24_p2, %s615_s11, %s26_s22  }
  0x2c   : > { %p35_p8 = por %p34_p4, %p33_p1  ;;  %p855_p10 = scmp.eq.s32.totalorder %s669_s13, 1 }
  0x2d   : > { %s123_s18 = sand.u32 1, %s615_s11   ;;  %s393_s24 = sshll.u32 %s619_s12, 4 }
  0x2e   : > { %p739_p12 = por %p855_p10, %p33_p1  ;;  %s748_s26 = scalar_lea.hbm %s845_s0, %s393_s24 }
  0x2f   : > { %s126_s19 = scalar_lea.vmem [#allocation2], %s123_s18  ;;  %p752_p11 = pnand %p446_p6, %p35_p8 }
  0x30   : > { %s133_s22 = sshll.u32 %s126_s19, 4  ;;  %s124_s27 = scalar_lea.sflag [#allocation3], %s123_s18  ;;  %s750_s22 = int_to_ptr.vmem [resolvable:$true] %s133_s22 }
  0x31   : > { %s519_s28 = scalar_lea.hbm %s748_s26, 16  ;;  %p521_p0 = pneg %p752_p11 }
  0x32   : > { %p520_p13 = scmp.ne.s32.totalorder %s748_s26, %s519_s28  ;;  %s524_s3 = scalar_lea.hbm %s845_s0, 32 }
  0x33   : > { %p525_p7 = scmp.lt.u32.totalorder %s748_s26, %s845_s0  ;;  %p526_p9 = scmp.lt.u32.totalorder %s524_s3, %s519_s28 }
  0x34   : > { %p522_p3 = pnand %p521_p0, %p520_p13  ;;  %p528_p1 = scmp.lt.u32.totalorder %s519_s28, %s748_s26 }
  0x35   : > { %p527_p2 = por %p526_p9, %p525_p7 }
  0x36   : > { %p523_p5 = pneg %p522_p3 }
  0x37   : > { %p529_p4 = por %p528_p1, %p527_p2 }
  0x39   : > { %p530_p6 = pnand %p529_p4, %p523_p5 }
  0x3b   : > { %533 = shalt.err (!%p530_p6)
}
  0x3c   : > { %s534_s6 = scalar_lea.vmem %s750_s22, 16  ;;  %s624_s7 = smov [#allocation2]  }
  0x3d   : > { %p535_p8 = scmp.ne.s32.totalorder %s750_s22, %s534_s6  ;;  %s539_s18 = sshll.u32 %s624_s7, 4  ;;  %s540_s18 = int_to_ptr.vmem [resolvable:$false] %s539_s18 }
  0x3e   : > { %s541_s24 = scalar_lea.vmem %s540_s18, 32  ;;  %p542_p3 = scmp.lt.s32.totalorder %s750_s22, %s540_s18 }
  0x3f   : > { %p537_p10 = pnand %p535_p8, %p521_p0  ;;  %p543_p7 = scmp.lt.s32.totalorder %s541_s24, %s534_s6 }
  0x41   : > { %p538_p13 = pneg %p537_p10  ;;  %p544_p9 = por %p543_p7, %p542_p3 }
  0x43   : > { %p545_p2 = pnand %p544_p9, %p538_p13 }
  0x45   : > { %548 = shalt.err (!%p545_p2)
}
  0x46   : > { %440 = dma.hbm_to_vmem [thread:$0]  (!%p752_p11), %s748_s26, 16, %s750_s22, %s124_s27  }
  0x47   : > { %p858_p5 = scmp.ne.s32.totalorder %s853_s17, 0 }
  0x48   : > { %s784_s25 = sand.u32 (!%p858_p5), 1, %s611_s10   ;;  %p859_p0 = scmp.ne.s32.totalorder (!%p858_p5), %s851_s15, 0 }
  0x49   : > { %142 = sbr.rel (%p858_p5) target bundleno = 797 (0x31d), region = 28  ;;  %s145_s20 = scalar_lea.sflag (!%p858_p5), [#allocation3], %s784_s25 }
  0x4a   : > { %s147_s19 = scalar_lea.vmem (!%p858_p5), [#allocation2], %s784_s25 }
  0x50   : > { %594 = dma.done.wait (%p859_p0), %s145_s20, 16  }
  0x51   : > { %596 = vsyncadd (%p859_p0), %s145_s20, 4294967280  ;;  %p860_p1 = scmp.eq.s32.totalorder %s669_s13, 0 }
  0x53   : > { %598 = dma.done.wait (%p860_p1), [#allocation6], 512   ;;  %p861_p11 = pmov %p860_p1 }
  0x54   : > { %v174_v0 = vlaneseq  ;;  %v171_v3 = vld [vmem:[%s147_s19] sm:$0x1]  ;;  %v625_v4 = vmov 0   ;;  %s626_s17 = smov 1   ;;  %vm180_vm1 = vcmask 7168   ;;  %s627_s15 = smov 2  }
  0x55   : > { %600 = vsyncadd (%p861_p11), [#allocation6], 4294966784  ;;  %vm172_vm0 = vcmp.eq.s32.totalorder %v171_v3, 5  ;;  %vm189_vm2 = vcmask 15360   ;;  %v215_v12 = vld [vmem:[#allocation5] sm:$0xff]  ;;  %v216_v13 = vld [vmem:[#allocation5 + $0x8] sm:$0xff] }
  0x56   : > { %v175_v1 = vshrl.u32 %v174_v0, 7  ;;  %v173_v5 = vsel %vm172_vm0, 1, %v625_v4  ;;  %v217_v14 = vld [vmem:[#allocation5 + $0x10] sm:$0xff]  ;;  %v628_v16 = vmov 0.0|0.0   ;;  %v219_v17 = vmul.f32 0.17677669, %v215_v12 }
  0x57   : > { %419 = vmatprep.subr.bf16.mxu0 %v628_v16  ;;  %v220_v18 = vmul.f32 0.17677669, %v216_v13  ;;  %v218_v19 = vld [vmem:[#allocation5 + $0x18] sm:$0xff]  ;;  %v221_v21 = vmul.f32 0.17677669, %v217_v14  ;;  %s629_s26 = smov 4  }
  0x58   : > { %v176_v2 = vsub.s32 0, %v175_v1  ;;  %v222_v22 = vmul.f32 0.17677669, %v218_v19  ;;  %vm630_vm3 = vmmov 0   ;;  %v631_v26 = vmov 0.0   ;;  %s396_s22 = sshll.u32 %s784_s25, 3 }
  0x59   : > { %v420_v23 = vpack.c.bf16 %v220_v18, %v219_v17  ;;  %416 = vmatprep.mubr.msk.f32.mxu0 %vm630_vm3, %v631_v26  ;;  %vm198_vm4 = vcmask 31744   ;;  %v204_v32 = vand.u32 127, %v174_v0  ;;  %vm223_vm6 = vcmask 261120   ;;  %s400_s23 = sshll.u32 %s669_s13, 7  ;;  %s170_s27 = scalar_lea.vmem [#allocation7], %s396_s22 }
  0x5a   : > { %v177_v6 = vrot.slane %v173_v5, %v176_v2  ;;  %v423_v25 = vpack.c.bf16 %v222_v22, %v221_v21  ;;  %s312_s28 = sshll.u32 %s170_s27, 4  ;;  %s801_s3 = scalar_lea.hbm %s847_s2, %s400_s23  ;;  %s803_s28 = int_to_ptr.vmem [resolvable:$true] %s312_s28 }
  0x5b   : > { %421 = vmatpush3.bf16.msra.mxu0 %v420_v23  ;;  %s299_s4 = scalar_lea.sflag [#allocation4], %s784_s25  ;;  %s549_s5 = scalar_lea.vmem %s803_s28, 128 }
  0x5c   : > { %178 = vrot.lane.b32.xlu0 %v177_v6, %s626_s17  ;;  %422 = vmatprep.subr.bf16.mxu0 %v628_v16  ;;  %p550_p4 = scmp.ne.s32.totalorder %s803_s28, %s549_s5  ;;  %s632_s13 = smov [#allocation7]  }
  0x5d   : > { %s553_s6 = sshll.u32 %s632_s13, 4  ;;  %s554_s6 = int_to_ptr.vmem [resolvable:$false] %s553_s6 }
  0x5e   : > { %p551_p6 = pnand %p550_p4, %p739_p12  ;;  %s555_s7 = scalar_lea.vmem %s554_s6, 256 }
  0x5f   : > { %424 = vmatpush3.bf16.msra.mxu0 %v423_v25  ;;  %p556_p10 = scmp.lt.s32.totalorder %s803_s28, %s554_s6  ;;  %p557_p13 = scmp.lt.s32.totalorder %s555_s7, %s549_s5 }
  0x60   : > { %p552_p8 = pneg %p551_p6 }
  0x61   : > { %p558_p3 = por %p557_p13, %p556_p10 }
  0x63   : > { %p559_p7 = pnand %p558_p3, %p552_p8 }
  0xce   : > { %v179_v7 = vpop.permute.xlu0 %178 }
  0xcf   : > { %v181_v8 = vsel %vm180_vm1, 0, %v179_v7 }
  0xd0   : > { %v182_v9 = vadd.s32 %v181_v8, %v173_v5 }
  0xd2   : > { %v186_v10 = vrot.slane %v182_v9, %v176_v2 }
  0xd4   : > { %187 = vrot.lane.b32.xlu0 %v186_v10, %s627_s15 }
 0x146   : > { %v188_v11 = vpop.permute.xlu0 %187 }
 0x147   : > { %v190_v15 = vsel %vm189_vm2, 0, %v188_v11 }
 0x148   : > { %v191_v20 = vadd.s32 %v190_v15, %v182_v9 }
 0x14a   : > { %v195_v24 = vrot.slane %v191_v20, %v176_v2 }
 0x14c   : > { %196 = vrot.lane.b32.xlu1 %v195_v24, %s629_s26 }
 0x1be   : > { %v197_v27 = vpop.permute.xlu1 %196 }
 0x1bf   : > { %v199_v28 = vsel %vm198_vm4, 0, %v197_v27 }
 0x1c0   : > { %v200_v29 = vadd.s32 %v199_v28, %v191_v20 }
 0x1c2   : > { %vm201_vm5 = vcmp.lt.s32.totalorder %v200_v29, 31 }
 0x1c3   : > { %v202_v30 = vsel %vm201_vm5, %v200_v29, 31 }
 0x1c4   : > { %v208_v31 = vrot.slane %v202_v30, %v176_v2 }
 0x1c6   : > { %210 = vbcast.lane.b32.xlu1 %v208_v31, 256 }
 0x238   : > { %v211_v33 = vpop.permute.xlu1 %210 }
 0x239   : > { %vm212_vm7 = vcmp.eq.s32.totalorder %v211_v33, %v204_v32 }
 0x23a   : > { %v397_v34 = vsel %vm212_vm7, 1.0, %v631_v26 }
 0x23b   : > { %417 = vmatmul.mubr.msk.f32.vlgmr.msra.gmra.mrb[0].mxu0 %vm223_vm6, %v397_v34 }
 0x30e   : > { %v293_v35 = vpop.f32.mrb[0].mxu0 }
 0x30f   : > { %297 = vst.msk [vmem:[%s170_s27] sm:$0xff] %vm223_vm6, %v293_v35  ;;  %v418_v36 = vpop.f32.mrb[1].mxu0 }
 0x310   : > { %562 = shalt.err (!%p559_p7)
}
 0x311   : > { %s563_s18 = scalar_lea.hbm %s801_s3, 128  ;;  %s567_s20 = scalar_lea.hbm %s847_s2, 256 }
 0x312   : > { %p564_p9 = scmp.ne.s32.totalorder %s801_s3, %s563_s18  ;;  %p568_p0 = scmp.lt.u32.totalorder %s801_s3, %s847_s2 }
 0x313   : > { %p569_p1 = scmp.lt.u32.totalorder %s567_s20, %s563_s18  ;;  %p571_p4 = scmp.lt.u32.totalorder %s563_s18, %s801_s3 }
 0x314   : > { %p565_p2 = pnand %p564_p9, %p739_p12 }
 0x315   : > { %p570_p11 = por %p569_p1, %p568_p0 }
 0x316   : > { %p566_p5 = pneg %p565_p2 }
 0x317   : > { %p572_p6 = por %p571_p4, %p570_p11 }
 0x319   : > { %p573_p8 = pnand %p572_p6, %p566_p5 }
 0x31b   : > { %576 = shalt.err (!%p573_p8)
}
 0x31c   : > { %431 = dma.vmem_to_hbm [thread:$0]  (%p739_p12), %s803_s28, 128, %s801_s3, %s299_s4  }
 0x31d PF: > { %s324_s15 = sand.u32 1, %s607_s9   ;;  %p862_p10 = scmp.ne.s32.totalorder %s852_s16, 0 }
 0x31e   : > { %p863_p13 = scmp.ge.s32.totalorder %s619_s12, 2  ;;  %s325_s26 = scalar_lea.sflag [#allocation4], %s324_s15 }
 0x320   : > { %p442_p3 = pnand %p863_p13, %p862_p10 }
 0x322   : > { %602 = dma.done.wait (!%p442_p3), %s325_s26, 128  }
 0x323   : > { %604 = vsyncadd (!%p442_p3), %s325_s26, 4294967168  ;;  %p16_p7 = scmp.ge.s32.totalorder %s704_s21, 4   ;;  %s864_s9 = smov %s611_s10 }
 0x324   : > { %s865_s10 = smov %s615_s11  ;;  %s866_s11 = smov %s735_s8 }
 0x325   : > { %s867_s12 = smov %s704_s21  ;;  %18 = sbr.rel (!%p16_p7) target bundleno = 6 (0x6), region = 77 }
 0x32c   :  { %330 = vsyncpa [#allocation3], 1 }
 0x32d   :  { %332 = vsyncpa [#allocation3 + $0x1], 1 }
 0x32e   :  { %333 = vsyncpa [#allocation6], 1 }
 0x32f   :  { %334 = vsyncpa [#allocation4], 1 }
 0x330   :  { %336 = vsyncpa [#allocation4 + $0x1], 1 }

</bundles_post_ra>
